<compile_context>
chip_gen: v7x
topology: tpu7x:2x2x1
jax: 0.10.0
libtpu: 0.0.40
codegen_flags: <defaults>
</compile_context>

<pallas_src>
import functools

import jax
import jax.numpy as jnp
from jax.experimental import pallas as pl
from jax.experimental.pallas import tpu as pltpu


def _focal_loss_kernel(logits_ref, targets_ref, out_ref, *,
                       alpha, gamma, tile_n, n_total):
    i = pl.program_id(0)

    logits = logits_ref[...].astype(jnp.float32)        # (tile_n, C) upcast in-kernel
    tgt = targets_ref[...]                               # (tile_n, 1) int32

    # Numerically-stable log-softmax pieces along the class (lane) axis.
    m = jnp.max(logits, axis=-1, keepdims=True)           # (tile_n, 1)   XLU
    shifted = logits - m                                   # (tile_n, C)   VPU
    sumexp = jnp.sum(jnp.exp(shifted), axis=-1, keepdims=True)   # EUP + XLU

    # "Gather" the target column with a bool mask feeding the lane reduction
    # (no dynamic lane gather on TPU, no materialized f32 one-hot).
    classes = jax.lax.broadcasted_iota(jnp.int32, logits.shape, 1)
    shifted_tgt = jnp.sum(jnp.where(classes == tgt, shifted, 0.0),
                          axis=-1, keepdims=True)          # (tile_n, 1)

    # ce == F.cross_entropy(reduction='none'); pt == exp(-ce) exactly as the
    # PyTorch module writes it (tile_n EUP ops, EUP slot has slack here).
    ce = jnp.log(sumexp) - shifted_tgt                     # (tile_n, 1)
    pt = jnp.exp(-ce)                                      # (tile_n, 1)
    one_minus_pt = 1.0 - pt

    if gamma == 2.0:
        modulator = one_minus_pt * one_minus_pt
    elif gamma == 1.0:
        modulator = one_minus_pt
    elif gamma == 0.0:
        modulator = jnp.ones_like(one_minus_pt)
    else:
        # General float gamma: x**g = exp(g*log(x)), clamped for x -> 0 (and
        # the rounding case pt slightly > 1, where torch.pow would NaN).
        modulator = jnp.exp(gamma * jnp.log(jnp.maximum(one_minus_pt, 1e-30)))

    focal = alpha * modulator * ce                         # (tile_n, 1)

    # Mask padded rows of the final (partial) tile out of the reduction.
    # (Do NOT remove/reorder: the padded rows hold garbage the DMA brought in.)
    row = jax.lax.broadcasted_iota(jnp.int32, focal.shape, 0) + i * tile_n
    focal = jnp.where(row < n_total, focal, 0.0)

    # One lane-dense (1, 1, 128) partial-sum block per tile (unmasked stores).
    out_ref[...] = jnp.full(out_ref.shape, jnp.sum(focal), dtype=out_ref.dtype)


def _vmem_capacity_bytes():
    """Per-core VMEM capacity for this generation (conservative fallback)."""
    try:
        cap = getattr(pltpu.get_tpu_info(), "vmem_capacity_bytes", None)
        if cap:
            return int(cap)
    except Exception:
        pass
    return 64 << 20        # v7x per-TC VMEM; safe lower bound for v5e/v6e (128 MiB)


def _tile_plan(n, c, in_itemsize, tile_n=None):
    """Pick (tile_n, vmem_limit_bytes) from C and this generation's VMEM."""
    c_pad = ((max(c, 1) + 127) // 128) * 128
    cap = _vmem_capacity_bytes()
    vmem_limit = int(0.75 * cap)           # raise scoped VMEM (v5e default is 16 MiB)
    if tile_n is None:
        budget = int(0.6 * vmem_limit)     # headroom for Mosaic-internal scratch
        per_row = (2 * c_pad * in_itemsize   # double-buffered logits block (native dtype)
                   + 2 * 128 * 4             # double-buffered (tile_n, 1) targets, lane-padded
                   + 4 * c_pad * 4)          # ~4 live (tile_n, C_pad) f32 temporaries
        tile_n = max(8, min(budget // per_row, 8192))
    if tile_n >= n:
        tile_n = n
    else:
        tile_n = max(8, (int(tile_n) // 8) * 8)
    return int(tile_n), int(vmem_limit)


def focal_loss(logits, targets, *, alpha=0.25, gamma=2.0, weight=None,
               size_average=True, tile_n=None):
    """Pallas-TPU focal loss matching PyTorch FocalLoss.forward (weight=None).

    logits:  (N, C) float array (any float dtype; upcast to f32 in-kernel)
    targets: (N,)   integer class indices
    returns: f32 scalar
    """
    # TODO(synk): per-class `weight` (F.cross_entropy(weight=...)) not
    # implemented; the module's default weight=None is supported.
    assert weight is None, "class weights not supported"
    n, c = logits.shape
    targets2d = targets.reshape(n, 1).astype(jnp.int32)

    tile_n, vmem_limit = _tile_plan(n, c, jnp.dtype(logits.dtype).itemsize, tile_n)
    num_tiles = pl.cdiv(n, tile_n)

    kernel = functools.partial(
        _focal_loss_kernel,
        alpha=float(alpha), gamma=float(gamma), tile_n=tile_n, n_total=n,
    )

    partials = pl.pallas_call(
        kernel,
        out_shape=jax.ShapeDtypeStruct((num_tiles, 1, 128), jnp.float32),
        grid=(num_tiles,),
        in_specs=[
            pl.BlockSpec((tile_n, c), lambda i: (i, 0)),   # native dtype in HBM
            pl.BlockSpec((tile_n, 1), lambda i: (i, 0)),
        ],
        out_specs=pl.BlockSpec((1, 1, 128), lambda i: (i, 0, 0)),
        compiler_params=pltpu.CompilerParams(
            dimension_semantics=("parallel",),
            vmem_limit_bytes=vmem_limit),
    )(logits, targets2d)

    total = jnp.sum(partials[:, 0, 0])
    return total / float(n) if size_average else total


def _focal_loss_ref(logits, targets, *, alpha=0.25, gamma=2.0,
                    size_average=True):
    """Pure-JAX reference mirroring the PyTorch module (sanity check)."""
    logits = logits.astype(jnp.float32)
    log_p = jax.nn.log_softmax(logits, axis=-1)
    ce = -jnp.take_along_axis(log_p, targets[:, None].astype(jnp.int32),
                              axis=-1)[:, 0]
    pt = jnp.exp(-ce)
    focal = alpha * (1.0 - pt) ** gamma * ce
    return focal.mean() if size_average else focal.sum()


if __name__ == "__main__":
    key = jax.random.PRNGKey(0)
    k_logits, k_tgt = jax.random.split(key)

    N, C = 20, 10                    # small classification problem
    logits = jax.random.normal(k_logits, (N, C), dtype=jnp.float32)
    targets = jax.random.randint(k_tgt, (N,), 0, C, dtype=jnp.int32)

    ref_mean = _focal_loss_ref(logits, targets, alpha=0.25, gamma=2.0,
                               size_average=True)
    ref_sum = _focal_loss_ref(logits, targets, alpha=0.25, gamma=2.0,
                              size_average=False)

    # tile_n=8 -> 3-step grid with a masked partial last tile (exercises the
    # tiled / per-tile-partial path even at demo size).
    out = focal_loss(logits, targets, alpha=0.25, gamma=2.0,
                     size_average=True, tile_n=8)
    out = jax.block_until_ready(out)
    assert jnp.allclose(out, ref_mean, rtol=1e-4, atol=1e-6), (out, ref_mean)

    out_sum = focal_loss(logits, targets, alpha=0.25, gamma=2.0,
                         size_average=False, tile_n=8)
    out_sum = jax.block_until_ready(out_sum)
    assert jnp.allclose(out_sum, ref_sum, rtol=1e-4, atol=1e-6), (out_sum, ref_sum)

    # Auto tile plan (single-tile path; exercises the VMEM-budget heuristic).
    out_auto = focal_loss(logits, targets, alpha=0.25, gamma=2.0,
                          size_average=True)
    out_auto = jax.block_until_ready(out_auto)
    assert jnp.allclose(out_auto, ref_mean, rtol=1e-4, atol=1e-6), (out_auto, ref_mean)

    print("KERNEL_OK")
</pallas_src>

<mosaic_0001>
module attributes {stable_mosaic.version = 11 : i64} {
  func.func @_focal_loss_kernel(%arg0: i32, %arg1: memref<8x10xf32, #tpu.memory_space<vmem>>, %arg2: memref<8x1xi32, #tpu.memory_space<vmem>>, %arg3: memref<1x1x128xf32, #tpu.memory_space<vmem>>) attributes {dimension_semantics = [#tpu.dimension_semantics<parallel>], iteration_bounds = array<i64: 3>, scalar_prefetch = 0 : i64, scratch_operands = 0 : i64, tpu.core_type = #tpu.core_type<tc>, window_params = [{transform_indices = @transform_0, window_bounds = array<i64: 8, 10>}, {transform_indices = @transform_1, window_bounds = array<i64: 8, 1>}, {transform_indices = @transform_2, window_bounds = array<i64: 1, 1, 128>}]} {
    %c0 = arith.constant 0 : index
    %c0_0 = arith.constant 0 : index
    %0 = vector.load %arg1[%c0, %c0_0] : memref<8x10xf32, #tpu.memory_space<vmem>>, vector<8x10xf32>
    %c0_1 = arith.constant 0 : index
    %c0_2 = arith.constant 0 : index
    %1 = vector.load %arg2[%c0_1, %c0_2] : memref<8x1xi32, #tpu.memory_space<vmem>>, vector<8x1xi32>
    %cst = arith.constant dense<0xFF800000> : vector<8xf32>
    %2 = vector.multi_reduction <maximumf>, %0, %cst [1] : vector<8x10xf32> to vector<8xf32>
    %3 = vector.shape_cast %2 : vector<8xf32> to vector<8x1xf32>
    %4 = vector.broadcast %3 : vector<8x1xf32> to vector<8x10xf32>
    %5 = arith.subf %0, %4 : vector<8x10xf32>
    %6 = math.exp %5 : vector<8x10xf32>
    %cst_3 = arith.constant dense<0.000000e+00> : vector<8xf32>
    %7 = vector.multi_reduction <add>, %6, %cst_3 [1] : vector<8x10xf32> to vector<8xf32>
    %8 = vector.shape_cast %7 : vector<8xf32> to vector<8x1xf32>
    %9 = tpu.iota {dimensions = array<i32: 1>} : vector<8x10xi32>
    %10 = vector.broadcast %1 : vector<8x1xi32> to vector<8x10xi32>
    %11 = arith.cmpi eq, %9, %10 : vector<8x10xi32>
    %cst_4 = arith.constant 0.000000e+00 : f32
    %12 = vector.broadcast %cst_4 : f32 to vector<8x10xf32>
    %13 = arith.select %11, %5, %12 : vector<8x10xi1>, vector<8x10xf32>
    %cst_5 = arith.constant dense<0.000000e+00> : vector<8xf32>
    %14 = vector.multi_reduction <add>, %13, %cst_5 [1] : vector<8x10xf32> to vector<8xf32>
    %15 = vector.shape_cast %14 : vector<8xf32> to vector<8x1xf32>
    %16 = math.log %8 : vector<8x1xf32>
    %17 = arith.subf %16, %15 : vector<8x1xf32>
    %cst_6 = arith.constant 0.000000e+00 : f32
    %18 = vector.broadcast %cst_6 : f32 to vector<8x1xf32>
    %19 = arith.subf %18, %17 : vector<8x1xf32>
    %20 = math.exp %19 : vector<8x1xf32>
    %cst_7 = arith.constant 1.000000e+00 : f32
    %21 = vector.broadcast %cst_7 : f32 to vector<8x1xf32>
    %22 = arith.subf %21, %20 : vector<8x1xf32>
    %23 = arith.mulf %22, %22 : vector<8x1xf32>
    %cst_8 = arith.constant 2.500000e-01 : f32
    %24 = vector.broadcast %cst_8 : f32 to vector<8x1xf32>
    %25 = arith.mulf %24, %23 : vector<8x1xf32>
    %26 = arith.mulf %25, %17 : vector<8x1xf32>
    %27 = tpu.iota {dimensions = array<i32: 0>} : vector<8x1xi32>
    %c8_i32 = arith.constant 8 : i32
    %28 = arith.muli %arg0, %c8_i32 : i32
    %29 = vector.broadcast %28 : i32 to vector<8x1xi32>
    %30 = arith.addi %27, %29 : vector<8x1xi32>
    %c20_i32 = arith.constant 20 : i32
    %31 = vector.broadcast %c20_i32 : i32 to vector<8x1xi32>
    %32 = arith.cmpi slt, %30, %31 : vector<8x1xi32>
    %cst_9 = arith.constant 0.000000e+00 : f32
    %33 = vector.broadcast %cst_9 : f32 to vector<8x1xf32>
    %34 = arith.select %32, %26, %33 : vector<8x1xi1>, vector<8x1xf32>
    %35 = vector.shape_cast %34 : vector<8x1xf32> to vector<1x8x1xf32>
    %cst_10 = arith.constant dense<0.000000e+00> : vector<1xf32>
    %36 = vector.multi_reduction <add>, %35, %cst_10 [1, 2] : vector<1x8x1xf32> to vector<1xf32>
    %37 = vector.shape_cast %36 : vector<1xf32> to vector<1x1x1xf32>
    %38 = vector.extract %37[0, 0, 0] : f32 from vector<1x1x1xf32>
    %39 = vector.broadcast %38 : f32 to vector<1x1x128xf32>
    %c0_11 = arith.constant 0 : index
    %c0_12 = arith.constant 0 : index
    %c0_13 = arith.constant 0 : index
    %40 = vector.load %arg3[%c0_11, %c0_12, %c0_13] : memref<1x1x128xf32, #tpu.memory_space<vmem>>, vector<1x1x128xf32>
    tpu.vector_store %arg3[%c0_11, %c0_12, %c0_13], %39 {strides = array<i32>} : memref<1x1x128xf32, #tpu.memory_space<vmem>>, vector<1x1x128xf32>,
    return
  }
  func.func @transform_0(%arg0: i32) -> (i32, i32) {
    %c0_i32 = arith.constant 0 : i32
    %c0_i32_0 = arith.constant 0 : i32
    return %arg0, %c0_i32 : i32, i32
  }
  func.func @transform_1(%arg0: i32) -> (i32, i32) {
    %c0_i32 = arith.constant 0 : i32
    %c0_i32_0 = arith.constant 0 : i32
    return %arg0, %c0_i32 : i32, i32
  }
  func.func @transform_2(%arg0: i32) -> (i32, i32, i32) {
    %c0_i32 = arith.constant 0 : i32
    %c0_i32_0 = arith.constant 0 : i32
    %c0_i32_1 = arith.constant 0 : i32
    return %arg0, %c0_i32, %c0_i32_0 : i32, i32, i32
  }
}

</mosaic_0001>

<bundles_post_ra>
// kernel: tpu_custom_call.1
= control target key start
LH: loop header
LB: loop body
LE: loop exit
PB: predicated region body
PF: predicated region fallthrough
CT: control target
= control target key end

     0   :  { %7 = vsyncpa [#allocation3], 0  ;;  %s534_s0 = inlined_call_operand.vmem [shape: f32[20,10], index: 0, kind: input, shape index: {}]   ;;  %s535_s1 = inlined_call_operand.vmem [shape: s32[20,1], index: 1, kind: input, shape index: {}]   ;;  %s536_s2 = inlined_call_operand.hbm [shape: f32[3,1,128], index: 2, kind: output, shape index: {}]  }
   0x1   :  { %9 = vsyncpa [#allocation3 + $0x1], 0  ;;  %s427_s9 = smov 0   ;;  %s429_s10 = smov 0  }
   0x2   :  { %s431_s11 = smov 0   ;;  %s433_s12 = smov 0  }
   0x3 LB: > { %s448_s13 = sadd.s32 4294967295, %s408_s12   ;;  %s287_s14 = sadd.s32 4294967294, %s408_s12   ;;  %s408_s12 = sphi %s433_s12, %s542_s12   ;;  %s404_s11 = sphi %s431_s11, %s541_s11   ;;  %s400_s10 = sphi %s429_s10, %s540_s10   ;;  %s396_s9 = sphi %s427_s9, %s539_s9  }
   0x4   : > { %s452_s15 = sadd.s32 1, %s408_s12   ;;  %s74_s16 = sadd.s32 1, %s404_s11 }
   0x5   : > { %s71_s17 = ssub.s32 %s408_s12, %s452_s15  ;;  %p84_p0 = scmp.ne.s32.totalorder %s404_s11, %s400_s10 }
   0x6   : > { %p72_p1 = scmp.eq.s32.totalorder %s71_s17, 0  ;;  %p85_p2 = scmp.eq.s32.totalorder %s448_s13, 2 }
   0x7   : > { %p90_p3 = scmp.ne.s32.totalorder %s400_s10, %s396_s9  ;;  %p91_p4 = scmp.eq.s32.totalorder %s287_s14, 2 }
   0x8   : > { %s463_s18 = scalar_select %p72_p1, %s404_s11, %s74_s16  }
   0x9   : > { %p465_p5 = por %p85_p2, %p84_p0  ;;  %p469_p6 = por %p91_p4, %p90_p3 }
   0xa   : > { %p290_p7 = scmp.ge.s32.totalorder %s408_s12, 1  ;;  %p123_p8 = scmp.lt.s32.totalorder %s408_s12, 4 }
   0xc   : > { %p124_p9 = pnand %p290_p7, %p123_p8 }
   0xd   : > { %p147_p10 = scmp.lt.s32.totalorder (!%p124_p9), %s448_s13, 2  ;;  %v410_v0 = vmov (!%p124_p9), 0   ;;  %vm157_vm0 = vcmask (!%p124_p9), 80896   ;;  %v167_v7 = vlaneseq (!%p124_p9)  ;;  %s293_s29 = sshll.u32 (!%p124_p9), %s448_s13, 3  ;;  %vm194_vm3 = vcmask (!%p124_p9), 7168  }
   0xe   : > { %127 = sbr.rel (%p124_p9) target bundleno = 586 (0x24a), region = 28  ;;  %339 = vset.pattern.permute.xlu0 (!%p124_p9), %v410_v0  ;;  %v190_v22 = vstv (!%p124_p9), %s293_s29  ;;  %s145_s30 = sand.u32 (!%p124_p9), 1, %s400_s10  }
   0xf   : > { %v168_v8 = vand.u32 (!%p124_p9), 127, %v167_v7  ;;  %v188_v21 = vshrl.u32 (!%p124_p9), %v167_v7, 7  ;;  %s146_s3 = scalar_lea.vmem (!%p124_p9), [#allocation2], %s145_s30  ;;  %s294_s5 = sshll.u32 (!%p124_p9), %s448_s13, 4 }
  0x10   : > { %s220_s4 = sshll.u32 (!%p124_p9), %s146_s3, 4  ;;  %s494_s14 = scalar_lea.hbm (!%p124_p9), %s536_s2, %s294_s5  ;;  %s489_s4 = int_to_ptr.vmem [resolvable:$true] %s220_s4 }
  0x11   : > { %v191_v25 = vadd.s32 (!%p124_p9), %v190_v22, %v188_v21  ;;  %s208_s16 = scalar_lea.sflag (!%p124_p9), [#allocation3], %s145_s30  ;;  %s346_s17 = scalar_lea.vmem (!%p124_p9), %s489_s4, 16 }
  0x12   : > { %p347_p11 = scmp.ne.s32.totalorder (!%p124_p9), %s489_s4, %s346_s17 }
  0x13   : > { %vm192_vm2 = vcmp.lt.s32.totalorder (!%p124_p9), %v191_v25, 20 }
  0x14   : > { %p348_p12 = pnand (!%p124_p9), %p347_p11, %p465_p5 }
  0x15   : > { %s148_s21 = scalar_select %p147_p10, %s448_s13, 2 }
  0x16   : > { %p349_p13 = pneg %p348_p12  ;;  %s411_s13 = smov [#allocation2]  }
  0x17   : > { %s291_s22 = sshll.u32 %s148_s21, 3  ;;  %s350_s21 = sshll.u32 %s411_s13, 4  ;;  %s351_s21 = int_to_ptr.vmem [resolvable:$false] %s350_s21 }
  0x18   : > { %s150_s25 = scalar_lea.vmem %s534_s0, %s291_s22  ;;  %s154_s28 = scalar_lea.vmem %s535_s1, %s291_s22 }
  0x19   : > { %v155_v1 = vld [vmem:[%s150_s25] sm:$0xff]  ;;  %s352_s22 = scalar_lea.vmem %s351_s21, 32  ;;  %p353_p0 = scmp.lt.s32.totalorder %s489_s4, %s351_s21 }
  0x1a   : > { %v158_v2 = vsel %vm157_vm0, %v155_v1, -inf  ;;  %v156_v3 = vld [vmem:[%s154_s28] sm:$0xff]  ;;  %p354_p1 = scmp.lt.s32.totalorder %s352_s22, %s346_s17 }
  0x1b   : > { %159 = vmax.xlane.f32.xlu0 %v158_v2 }
  0x1c   : > { %p355_p2 = por %p354_p1, %p353_p0 }
  0x1e   : > { %p356_p3 = pnand %p355_p2, %p349_p13 }
  0x31   : > { %170 = vperm.xlu0 %339, %v156_v3  }
  0xa8   : > { %v160_v4 = vpop.xlane.xlu0 %159 }
  0xa9   : > { %v161_v5 = vsub.f32 %v155_v1, %v160_v4 }
  0xab   : > { %v162_v6 = vmul.f32 1.442695, %v161_v5 }
  0xad   : > { %340 = vpow2.f32 %v162_v6 }
  0xb0   : > { %v171_v9 = vpop.permute.xlu0 %170 }
  0xb1   : > { %vm172_vm1 = vcmp.eq.s32.totalorder %v168_v8, %v171_v9 }
  0xb2   : > { %v173_v12 = vsel %vm172_vm1, %v161_v5, 0.0 }
  0xb3   : > { %v174_v13 = vsel %vm157_vm0, %v173_v12, 0.0 }
  0xb7   : > { %v341_v10 = vpop.eup %340 }
  0xb8   : > { %v164_v11 = vsel %vm157_vm0, %v341_v10, 0.0 }
  0xb9   : > { %165 = vadd.xlane.f32.xlu1 %v164_v11 }
  0xbd   : > { %175 = vadd.xlane.f32.xlu1 %v174_v13 }
 0x146   : > { %v166_v14 = vpop.xlane.xlu1 %165 }
 0x147   : > { %342 = vlog2.f32 %v166_v14 }
 0x14a   : > { %v176_v17 = vpop.xlane.xlu1 %175 }
 0x151   : > { %v343_v15 = vpop.eup %342 }
 0x152   : > { %v178_v16 = vmul.f32 0.6931472, %v343_v15 }
 0x154   : > { %v179_v18 = vsub.f32 %v178_v16, %v176_v17 }
 0x156   : > { %v180_v19 = vsub.f32 0.0, %v179_v18 }
 0x158   : > { %v181_v20 = vmul.f32 1.442695, %v180_v19 }
 0x15a   : > { %344 = vpow2.f32 %v181_v20 }
 0x164   : > { %v345_v23 = vpop.eup %344 }
 0x165   : > { %v183_v24 = vsub.f32 1.0, %v345_v23 }
 0x167   : > { %v184_v26 = vmul.f32 %v183_v24, %v183_v24 }
 0x169   : > { %v185_v27 = vmul.f32 0.25, %v184_v26 }
 0x16b   : > { %v186_v28 = vmul.f32 %v185_v27, %v179_v18 }
 0x16d   : > { %v193_v29 = vsel %vm192_vm2, %v186_v28, 0.0 }
 0x16e   : > { %v195_v30 = vsel %vm194_vm3, %v193_v29, 0.0 }
 0x16f   : > { %196 = vadd.xlane.f32.xlu1 %v195_v30 }
 0x1fc   : > { %v197_v31 = vpop.xlane.xlu1 %196 }
 0x1fd   : > { %v198_v32 = vrot.slane %v197_v31, 4 }
 0x1ff   : > { %v199_v33 = vadd.f32 %v198_v32, %v197_v31 }
 0x201   : > { %v200_v34 = vrot.slane %v199_v33, 2 }
 0x203   : > { %v201_v35 = vadd.f32 %v200_v34, %v199_v33 }
 0x205   : > { %v202_v36 = vrot.slane %v201_v35, 1 }
 0x207   : > { %v203_v37 = vadd.f32 %v202_v36, %v201_v35 }
 0x209   : > { %297 = vpush %v203_v37 }
 0x23a   : > { %s298_s6 = spop %297 }
 0x23b   : > { %v205_v38 = vstv %s298_s6 }
 0x23c   : > { %206 = vst [vmem:[%s146_s3] sm:$0x1] %v205_v38 }
 0x23d   : > { %359 = shalt.err (!%p356_p3)
}
 0x23e   : > { %s360_s23 = scalar_lea.hbm %s494_s14, 16  ;;  %s364_s26 = scalar_lea.hbm %s536_s2, 48 }
 0x23f   : > { %p361_p4 = scmp.ne.s32.totalorder %s494_s14, %s360_s23  ;;  %p365_p9 = scmp.lt.u32.totalorder %s494_s14, %s536_s2 }
 0x240   : > { %p366_p10 = scmp.lt.u32.totalorder %s364_s26, %s360_s23  ;;  %p368_p12 = scmp.lt.u32.totalorder %s360_s23, %s494_s14 }
 0x241   : > { %p362_p7 = pnand %p361_p4, %p465_p5 }
 0x242   : > { %p367_p11 = por %p366_p10, %p365_p9 }
 0x243   : > { %p363_p8 = pneg %p362_p7 }
 0x244   : > { %p369_p13 = por %p368_p12, %p367_p11 }
 0x246   : > { %p370_p0 = pnand %p369_p13, %p363_p8 }
 0x248   : > { %373 = shalt.err (!%p370_p0)
}
 0x249   : > { %299 = dma.vmem_to_hbm [thread:$0]  (%p465_p5), %s489_s4, 16, %s494_s14, %s208_s16  }
 0x24a PF: > { %p305_p1 = scmp.ge.s32.totalorder %s408_s12, 2  ;;  %s232_s29 = sand.u32 1, %s396_s9  }
 0x24b   : > { %s233_s30 = scalar_lea.sflag [#allocation3], %s232_s29 }
 0x24c   : > { %p302_p2 = pnand %p305_p1, %p469_p6 }
 0x24e   : > { %391 = dma.done.wait (!%p302_p2), %s233_s30, 16  }
 0x24f   : > { %393 = vsyncadd (!%p302_p2), %s233_s30, 4294967280  ;;  %p12_p3 = scmp.ge.s32.totalorder %s452_s15, 5   ;;  %s539_s9 = smov %s400_s10 }
 0x250   : > { %s540_s10 = smov %s404_s11  ;;  %s541_s11 = smov %s463_s18 }
 0x251   : > { %s542_s12 = smov %s452_s15  ;;  %14 = sbr.rel (!%p12_p3) target bundleno = 3 (0x3), region = 66 }
 0x258   :  { %237 = vsyncpa [#allocation3], 1 }
 0x259   :  { %239 = vsyncpa [#allocation3 + $0x1], 1 }

</bundles_post_ra>
